<compile_context>
chip_gen: v6e
topology: v6e:2x2x1
jax: 0.10.0
libtpu: 0.0.40
codegen_flags: <defaults>
</compile_context>

<pallas_src>
import functools

import jax
import jax.numpy as jnp
from jax.experimental import pallas as pl
from jax.experimental.pallas import tpu as pltpu


def _round_up(a, b):
    return (a + b - 1) // b * b


# ----------------------------- pass 1: edge MLP ------------------------------
def _edge_mlp_kernel(e_ref, w1a_ref, b1a_ref, w1b_ref, b1b_ref, h_ref):
    # e_ref:   [E_t, F+H] bf16   cat([x[col], edge_attr], 1)
    # w1a_ref: [F+H, H]   bf16 ; b1a_ref: [1, H] f32
    # w1b_ref: [H, HP]    bf16   (columns >= H are zero)
    # b1b_ref: [1, HP]    f32    (b1b_ref[0, H] == 1 -> counts column; pad zero)
    # h_ref:   [E_t, HP]  bf16   h_aug = [mlp1(e) | 1 | 0...]
    f32, bf16 = jnp.float32, jnp.bfloat16
    pre = jnp.dot(e_ref[...], w1a_ref[...], preferred_element_type=f32) + b1a_ref[...]
    pre = jnp.maximum(pre, 0.0).astype(bf16)
    h = jnp.dot(pre, w1b_ref[...], preferred_element_type=f32) + b1b_ref[...]
    h_ref[...] = h.astype(h_ref.dtype)


# ------------------- pass 2: scatter-mean + node MLP -------------------------
def _scatter_node_mlp_kernel(h_ref, row_ref, xw2_ref, w2am_ref, w2b_ref, b2b_ref,
                             out_ref, acc_ref, *, hidden):
    # h_ref:   [E_t, HP]   bf16  augmented edge-MLP outputs (counts col at `hidden`)
    # row_ref: [1, E_t]    i32   destination node per edge (N_pad marks padding)
    # xw2_ref: [N_t, H]    f32   precomputed x @ w2a[:F] + b2a for this node tile
    # w2am_ref:[H, H]      bf16 ; w2b_ref: [H, T_pad] bf16 ; b2b_ref: [1, T_pad] f32
    # out_ref: [N_t, T_pad] f32 ; acc_ref: [N_t, HP] f32 scratch = [seg_sum | counts | 0]
    f32, bf16 = jnp.float32, jnp.bfloat16
    j = pl.program_id(1)
    n_tile = acc_ref.shape[0]
    e_tile = h_ref.shape[0]

    @pl.when(j == 0)
    def _init():
        acc_ref[...] = jnp.zeros_like(acc_ref)

    # scatter-add via one-hot segment matmul; 128-lane-dense accumulator update.
    node_base = pl.program_id(0) * n_tile
    node_iota = jax.lax.broadcasted_iota(jnp.int32, (n_tile, e_tile), 0) + node_base
    seg = (node_iota == row_ref[...]).astype(bf16)            # exact 0/1 in bf16
    acc_ref[...] += jnp.dot(seg, h_ref[...], preferred_element_type=f32)

    @pl.when(j == pl.num_programs(1) - 1)
    def _finalize():
        acc = acc_ref[...]
        seg_sum = acc[:, :hidden]                             # [N_t, H]
        counts = acc[:, hidden:hidden + 1]                    # [N_t, 1]
        mean = seg_sum * pl.reciprocal(jnp.maximum(counts, 1.0), approx=True)
        z = xw2_ref[...] + jnp.dot(mean.astype(bf16), w2am_ref[...],
                                   preferred_element_type=f32)
        z = jnp.maximum(z, 0.0).astype(bf16)
        out = jnp.dot(z, w2b_ref[...], preferred_element_type=f32) + b2b_ref[...]
        out_ref[...] = out.astype(out_ref.dtype)


@functools.partial(jax.jit, static_argnames=("node_tile", "edge_tile"))
def node_model_forward(params, x, edge_index, edge_attr, u=None, batch=None,
                       *, node_tile=128, edge_tile=2048):
    """Pallas implementation of NodeModel.forward. u/batch are unused (as in PyTorch)."""
    del u, batch
    f32, bf16 = jnp.float32, jnp.bfloat16

    N, F = x.shape
    E, H = edge_attr.shape
    T = params["w2b"].shape[1]

    # ---- tiling (lane/sublane aligned) ----
    E_t = max(128, _round_up(min(edge_tile, max(E, 1)), 128))   # always multiple of 128
    E_pad = _round_up(max(E, 1), E_t)
    N_t = min(node_tile, _round_up(max(N, 8), 8))
    # v7x megacore: make sure the "parallel" node axis has >= 2 tiles when N allows.
    if _round_up(max(N, 1), N_t) // N_t < 2 and _round_up(max(N, 8), 8) >= 16:
        N_t = _round_up(_round_up(max(N, 8), 8) // 2, 8)
    N_pad = _round_up(max(N, 1), N_t)
    HP = _round_up(H + 1, 128)            # lane-dense augmented hidden; counts at col H
    T_pad = _round_up(max(T, 1), 128)     # lane-dense output store

    row = edge_index[0].astype(jnp.int32)
    col = edge_index[1].astype(jnp.int32)

    # Padded edges get row = N_pad (strictly greater than any real/tile node id,
    # so their one-hot mask column is all zeros and they contribute nothing).
    row_p = jnp.full((E_pad,), N_pad, jnp.int32).at[:E].set(row)
    col_p = jnp.zeros((E_pad,), jnp.int32).at[:E].set(col)
    x_bf = x.astype(bf16)
    ea_p = jnp.zeros((E_pad, H), bf16).at[:E, :].set(edge_attr.astype(bf16))
    # First concat materialized once in the wrapper (F is tiny): mlp1 layer 1 is a
    # single K=F+H matmul instead of two near-empty MXU passes.
    e_cat = jnp.concatenate([jnp.take(x_bf, col_p, axis=0), ea_p], axis=1)   # [E_pad, F+H]
    row2d = row_p[None, :]                                                   # [1, E_pad]

    # mlp1 weights: bf16 MXU operands, f32 biases. w1b/b1b augmented to HP lanes:
    # column H carries the edge counts (zero weight, unit bias), the rest is zero.
    w1a = params["w1a"].astype(bf16)
    b1a = params["b1a"].astype(f32)
    w1b_aug = jnp.zeros((H, HP), f32).at[:, :H].set(params["w1b"]).astype(bf16)
    b1b_aug = jnp.zeros((1, HP), f32).at[:, :H].set(params["b1b"]).at[0, H].set(1.0)

    # mlp2: the x-only part of layer 1 is precomputed per node (exact f32, tiny),
    # so the kernel only adds mean @ w2a[F:].
    xw2 = x.astype(f32) @ params["w2a"][:F].astype(f32) + params["b2a"].astype(f32)
    xw2_p = jnp.zeros((N_pad, H), f32).at[:N, :].set(xw2)
    w2am = params["w2a"][F:].astype(bf16)
    w2b_p = jnp.zeros((H, T_pad), f32).at[:, :T].set(params["w2b"]).astype(bf16)
    b2b_p = jnp.zeros((1, T_pad), f32).at[:, :T].set(params["b2b"])

    # ---- pass 1: edge MLP, once per edge ----
    h_aug = pl.pallas_call(
        _edge_mlp_kernel,
        out_shape=jax.ShapeDtypeStruct((E_pad, HP), bf16),
        grid_spec=pltpu.PrefetchScalarGridSpec(
            num_scalar_prefetch=0,
            grid=(E_pad // E_t,),
            in_specs=[
                pl.BlockSpec((E_t, F + H), lambda j: (j, 0)),
                pl.BlockSpec((F + H, H), lambda j: (0, 0)),
                pl.BlockSpec((1, H), lambda j: (0, 0)),
                pl.BlockSpec((H, HP), lambda j: (0, 0)),
                pl.BlockSpec((1, HP), lambda j: (0, 0)),
            ],
            out_specs=pl.BlockSpec((E_t, HP), lambda j: (j, 0)),
        ),
        compiler_params=pltpu.CompilerParams(
            dimension_semantics=("parallel",),
            vmem_limit_bytes=32 * 1024 * 1024,
        ),
    )(e_cat, w1a, b1a, w1b_aug, b1b_aug)

    # ---- pass 2: tiled one-hot scatter-mean + node MLP ----
    const = lambda i, j: (0, 0)
    kernel2 = functools.partial(_scatter_node_mlp_kernel, hidden=H)
    out_padded = pl.pallas_call(
        kernel2,
        out_shape=jax.ShapeDtypeStruct((N_pad, T_pad), f32),
        grid_spec=pltpu.PrefetchScalarGridSpec(
            num_scalar_prefetch=0,
            grid=(N_pad // N_t, E_pad // E_t),          # edge axis = reduction, last
            in_specs=[
                pl.BlockSpec((E_t, HP), lambda i, j: (j, 0)),    # h_aug tile
                pl.BlockSpec((1, E_t), lambda i, j: (0, j)),     # row indices tile
                pl.BlockSpec((N_t, H), lambda i, j: (i, 0)),     # precomputed x @ w2a[:F] + b2a
                pl.BlockSpec((H, H), const),                     # w2a[F:]  (VMEM-resident)
                pl.BlockSpec((H, T_pad), const),                 # w2b (lane-padded)
                pl.BlockSpec((1, T_pad), const),                 # b2b (lane-padded)
            ],
            out_specs=pl.BlockSpec((N_t, T_pad), lambda i, j: (i, 0)),
            scratch_shapes=[pltpu.VMEM((N_t, HP), jnp.float32)],
        ),
        compiler_params=pltpu.CompilerParams(
            dimension_semantics=("parallel", "arbitrary"),
            vmem_limit_bytes=32 * 1024 * 1024,
        ),
    )(h_aug, row2d, xw2_p, w2am, w2b_p, b2b_p)

    return out_padded[:N, :T]


def init_params(key, n_node_features, hiddens, n_targets):
    """Deterministic synthetic weights (same shapes as the PyTorch module).

    PyTorch Linear stores W:[out,in] and computes y = x @ W.T + b; here we store
    the already-transposed [in,out] matrices so the kernels do plain x @ W.
    """
    F, H, T = n_node_features, hiddens, n_targets
    ks = jax.random.split(key, 8)
    scale = 0.1
    return {
        "w1a": scale * jax.random.normal(ks[0], (F + H, H), jnp.float32),
        "b1a": scale * jax.random.normal(ks[1], (1, H), jnp.float32),
        "w1b": scale * jax.random.normal(ks[2], (H, H), jnp.float32),
        "b1b": scale * jax.random.normal(ks[3], (1, H), jnp.float32),
        "w2a": scale * jax.random.normal(ks[4], (F + H, H), jnp.float32),
        "b2a": scale * jax.random.normal(ks[5], (1, H), jnp.float32),
        "w2b": scale * jax.random.normal(ks[6], (H, T), jnp.float32),
        "b2b": scale * jax.random.normal(ks[7], (1, T), jnp.float32),
    }


def _reference_forward(params, x, edge_index, edge_attr):
    """Pure-JAX f32 reference mirroring the PyTorch semantics (for verification)."""
    row, col = edge_index[0], edge_index[1]
    N = x.shape[0]
    e = jnp.concatenate([x[col], edge_attr], axis=1)
    h = jnp.maximum(e @ params["w1a"] + params["b1a"], 0.0) @ params["w1b"] + params["b1b"]
    seg_sum = jax.ops.segment_sum(h, row, num_segments=N)
    counts = jax.ops.segment_sum(jnp.ones((h.shape[0],), jnp.float32), row, num_segments=N)
    mean = seg_sum / jnp.maximum(counts, 1.0)[:, None]
    z = jnp.concatenate([x, mean], axis=1)
    z = jnp.maximum(z @ params["w2a"] + params["b2a"], 0.0)
    return z @ params["w2b"] + params["b2b"]


if __name__ == "__main__":
    # Small synthetic graph: N nodes, E directed edges (E > 128 so the padded/
    # tiled edge handling is exercised; N chosen so the node axis has 2 tiles).
    N_NODES = 16
    N_EDGES = 300
    N_NODE_FEATURES = 4
    HIDDENS = 32
    N_TARGETS = 8

    key = jax.random.PRNGKey(0)
    k_x, k_ei, k_ea, k_p = jax.random.split(key, 4)

    x = jax.random.normal(k_x, (N_NODES, N_NODE_FEATURES), jnp.float32)
    edge_index = jax.random.randint(k_ei, (2, N_EDGES), 0, N_NODES, dtype=jnp.int32)
    edge_attr = jax.random.normal(k_ea, (N_EDGES, HIDDENS), jnp.float32)
    u = jnp.zeros((1, HIDDENS), jnp.float32)          # unused by forward
    batch = jnp.zeros((N_NODES,), jnp.int32)          # unused by forward

    params = init_params(k_p, N_NODE_FEATURES, HIDDENS, N_TARGETS)

    out = node_model_forward(params, x, edge_index, edge_attr, u, batch)
    out = jax.block_until_ready(out)

    ref = _reference_forward(params, x, edge_index, edge_attr)
    assert out.shape == (N_NODES, N_TARGETS), out.shape
    # bf16 MXU operands + approx reciprocal for the mean => loosened tolerance
    # vs the f32 reference (documented; use exact f32 path if tighter is needed).
    max_err = float(jnp.max(jnp.abs(out - ref)))
    scale = float(jnp.max(jnp.abs(ref))) + 1e-6
    assert max_err <= 5e-2 * scale, f"mismatch vs JAX reference: {max_err} / {scale}"

    print("KERNEL_OK")
</pallas_src>

<mosaic_0001>
module attributes {stable_mosaic.version = 11 : i64} {
  func.func @_edge_mlp_kernel(%arg0: i32, %arg1: memref<384x36xbf16, #tpu.memory_space<vmem>>, %arg2: memref<36x32xbf16, #tpu.memory_space<vmem>>, %arg3: memref<1x32xf32, #tpu.memory_space<vmem>>, %arg4: memref<32x128xbf16, #tpu.memory_space<vmem>>, %arg5: memref<1x128xf32, #tpu.memory_space<vmem>>, %arg6: memref<384x128xbf16, #tpu.memory_space<vmem>>) attributes {dimension_semantics = [#tpu.dimension_semantics<parallel>], iteration_bounds = array<i64: 1>, scalar_prefetch = 0 : i64, scratch_operands = 0 : i64, tpu.core_type = #tpu.core_type<tc>, window_params = [{transform_indices = @transform_0, window_bounds = array<i64: 384, 36>}, {pipeline_mode = #tpu.pipeline_mode<synchronous>, transform_indices = @transform_1, window_bounds = array<i64: 36, 32>}, {pipeline_mode = #tpu.pipeline_mode<synchronous>, transform_indices = @transform_2, window_bounds = array<i64: 1, 32>}, {pipeline_mode = #tpu.pipeline_mode<synchronous>, transform_indices = @transform_3, window_bounds = array<i64: 32, 128>}, {pipeline_mode = #tpu.pipeline_mode<synchronous>, transform_indices = @transform_4, window_bounds = array<i64: 1, 128>}, {transform_indices = @transform_5, window_bounds = array<i64: 384, 128>}]} {
    %c0 = arith.constant 0 : index
    %c0_0 = arith.constant 0 : index
    %0 = vector.load %arg1[%c0, %c0_0] : memref<384x36xbf16, #tpu.memory_space<vmem>>, vector<384x36xbf16>
    %c0_1 = arith.constant 0 : index
    %c0_2 = arith.constant 0 : index
    %1 = vector.load %arg2[%c0_1, %c0_2] : memref<36x32xbf16, #tpu.memory_space<vmem>>, vector<36x32xbf16>
    %cst = arith.constant dense<0.000000e+00> : vector<384x32xf32>
    %2 = tpu.matmul %0, %1, %cst {dimension_numbers = #tpu.dot_dimension_numbers<[1], [0], [0], [1], [0, 0, 1, 1], [], []>} : vector<384x36xbf16>, vector<36x32xbf16>, vector<384x32xf32> -> vector<384x32xf32>
    %c0_3 = arith.constant 0 : index
    %c0_4 = arith.constant 0 : index
    %3 = vector.load %arg3[%c0_3, %c0_4] : memref<1x32xf32, #tpu.memory_space<vmem>>, vector<1x32xf32>
    %4 = vector.broadcast %3 : vector<1x32xf32> to vector<384x32xf32>
    %5 = arith.addf %2, %4 : vector<384x32xf32>
    %cst_5 = arith.constant 0.000000e+00 : f32
    %6 = vector.broadcast %cst_5 : f32 to vector<384x32xf32>
    %7 = arith.maximumf %5, %6 : vector<384x32xf32>
    %8 = arith.truncf %7 : vector<384x32xf32> to vector<384x32xbf16>
    %c0_6 = arith.constant 0 : index
    %c0_7 = arith.constant 0 : index
    %9 = vector.load %arg4[%c0_6, %c0_7] : memref<32x128xbf16, #tpu.memory_space<vmem>>, vector<32x128xbf16>
    %cst_8 = arith.constant dense<0.000000e+00> : vector<384x128xf32>
    %10 = tpu.matmul %8, %9, %cst_8 {dimension_numbers = #tpu.dot_dimension_numbers<[1], [0], [0], [1], [0, 0, 1, 1], [], []>} : vector<384x32xbf16>, vector<32x128xbf16>, vector<384x128xf32> -> vector<384x128xf32>
    %c0_9 = arith.constant 0 : index
    %c0_10 = arith.constant 0 : index
    %11 = vector.load %arg5[%c0_9, %c0_10] : memref<1x128xf32, #tpu.memory_space<vmem>>, vector<1x128xf32>
    %12 = vector.broadcast %11 : vector<1x128xf32> to vector<384x128xf32>
    %13 = arith.addf %10, %12 : vector<384x128xf32>
    %14 = arith.truncf %13 : vector<384x128xf32> to vector<384x128xbf16>
    %c0_11 = arith.constant 0 : index
    %c0_12 = arith.constant 0 : index
    %15 = vector.load %arg6[%c0_11, %c0_12] : memref<384x128xbf16, #tpu.memory_space<vmem>>, vector<384x128xbf16>
    tpu.vector_store %arg6[%c0_11, %c0_12], %14 {strides = array<i32>} : memref<384x128xbf16, #tpu.memory_space<vmem>>, vector<384x128xbf16>,
    return
  }
  func.func @transform_0(%arg0: i32) -> (i32, i32) {
    %c0_i32 = arith.constant 0 : i32
    %c0_i32_0 = arith.constant 0 : i32
    return %arg0, %c0_i32 : i32, i32
  }
  func.func @transform_1(%arg0: i32) -> (i32, i32) {
    %c0_i32 = arith.constant 0 : i32
    %c0_i32_0 = arith.constant 0 : i32
    %c0_i32_1 = arith.constant 0 : i32
    return %c0_i32, %c0_i32_0 : i32, i32
  }
  func.func @transform_2(%arg0: i32) -> (i32, i32) {
    %c0_i32 = arith.constant 0 : i32
    %c0_i32_0 = arith.constant 0 : i32
    %c0_i32_1 = arith.constant 0 : i32
    return %c0_i32, %c0_i32_0 : i32, i32
  }
  func.func @transform_3(%arg0: i32) -> (i32, i32) {
    %c0_i32 = arith.constant 0 : i32
    %c0_i32_0 = arith.constant 0 : i32
    %c0_i32_1 = arith.constant 0 : i32
    return %c0_i32, %c0_i32_0 : i32, i32
  }
  func.func @transform_4(%arg0: i32) -> (i32, i32) {
    %c0_i32 = arith.constant 0 : i32
    %c0_i32_0 = arith.constant 0 : i32
    %c0_i32_1 = arith.constant 0 : i32
    return %c0_i32, %c0_i32_0 : i32, i32
  }
  func.func @transform_5(%arg0: i32) -> (i32, i32) {
    %c0_i32 = arith.constant 0 : i32
    %c0_i32_0 = arith.constant 0 : i32
    return %arg0, %c0_i32 : i32, i32
  }
}

module attributes {stable_mosaic.version = 11 : i64} {
  func.func @_scatter_node_mlp_kernel(%arg0: i32, %arg1: i32, %arg2: memref<384x128xbf16, #tpu.memory_space<vmem>>, %arg3: memref<1x384xi32, #tpu.memory_space<vmem>>, %arg4: memref<8x32xf32, #tpu.memory_space<vmem>>, %arg5: memref<32x32xbf16, #tpu.memory_space<vmem>>, %arg6: memref<32x128xbf16, #tpu.memory_space<vmem>>, %arg7: memref<1x128xf32, #tpu.memory_space<vmem>>, %arg8: memref<8x128xf32, #tpu.memory_space<vmem>>, %arg9: memref<8x128xf32, #tpu.memory_space<vmem>>) attributes {dimension_semantics = [#tpu.dimension_semantics<parallel>, #tpu.dimension_semantics<arbitrary>], iteration_bounds = array<i64: 2, 1>, scalar_prefetch = 0 : i64, scratch_operands = 1 : i64, tpu.core_type = #tpu.core_type<tc>, window_params = [{transform_indices = @transform_0, window_bounds = array<i64: 384, 128>}, {transform_indices = @transform_1, window_bounds = array<i64: 1, 384>}, {transform_indices = @transform_2, window_bounds = array<i64: 8, 32>}, {pipeline_mode = #tpu.pipeline_mode<synchronous>, transform_indices = @transform_3, window_bounds = array<i64: 32, 32>}, {pipeline_mode = #tpu.pipeline_mode<synchronous>, transform_indices = @transform_4, window_bounds = array<i64: 32, 128>}, {pipeline_mode = #tpu.pipeline_mode<synchronous>, transform_indices = @transform_5, window_bounds = array<i64: 1, 128>}, {transform_indices = @transform_6, window_bounds = array<i64: 8, 128>}]} {
    %c0_i32 = arith.constant 0 : i32
    %0 = arith.cmpi eq, %arg1, %c0_i32 : i32
    %1 = arith.extui %0 : i1 to i32
    %c0_i32_0 = arith.constant 0 : i32
    %2 = arith.cmpi ne, %1, %c0_i32_0 : i32
    scf.if %2 {
      %cst_10 = arith.constant 0.000000e+00 : f32
      %21 = vector.broadcast %cst_10 : f32 to vector<8x128xf32>
      %c0_11 = arith.constant 0 : index
      %c0_12 = arith.constant 0 : index
      %22 = vector.load %arg9[%c0_11, %c0_12] : memref<8x128xf32, #tpu.memory_space<vmem>>, vector<8x128xf32>
      tpu.vector_store %arg9[%c0_11, %c0_12], %21 {strides = array<i32>} : memref<8x128xf32, #tpu.memory_space<vmem>>, vector<8x128xf32>,
    } else {
    }
    %c8_i32 = arith.constant 8 : i32
    %3 = arith.muli %arg0, %c8_i32 : i32
    %4 = tpu.iota {dimensions = array<i32: 0>} : vector<8x384xi32>
    %5 = vector.broadcast %3 : i32 to vector<8x384xi32>
    %6 = arith.addi %4, %5 : vector<8x384xi32>
    %c0 = arith.constant 0 : index
    %c0_1 = arith.constant 0 : index
    %7 = vector.load %arg3[%c0, %c0_1] : memref<1x384xi32, #tpu.memory_space<vmem>>, vector<1x384xi32>
    %8 = vector.broadcast %7 : vector<1x384xi32> to vector<8x384xi32>
    %9 = arith.cmpi eq, %6, %8 : vector<8x384xi32>
    %10 = arith.extui %9 : vector<8x384xi1> to vector<8x384xi32>
    %11 = arith.sitofp %10 : vector<8x384xi32> to vector<8x384xf32>
    %12 = arith.truncf %11 : vector<8x384xf32> to vector<8x384xbf16>
    %c0_2 = arith.constant 0 : index
    %c0_3 = arith.constant 0 : index
    %13 = vector.load %arg9[%c0_2, %c0_3] : memref<8x128xf32, #tpu.memory_space<vmem>>, vector<8x128xf32>
    %c0_4 = arith.constant 0 : index
    %c0_5 = arith.constant 0 : index
    %14 = vector.load %arg2[%c0_4, %c0_5] : memref<384x128xbf16, #tpu.memory_space<vmem>>, vector<384x128xbf16>
    %cst = arith.constant dense<0.000000e+00> : vector<8x128xf32>
    %15 = tpu.matmul %12, %14, %cst {dimension_numbers = #tpu.dot_dimension_numbers<[1], [0], [0], [1], [0, 0, 1, 1], [], []>} : vector<8x384xbf16>, vector<384x128xbf16>, vector<8x128xf32> -> vector<8x128xf32>
    %16 = arith.addf %13, %15 : vector<8x128xf32>
    %c0_6 = arith.constant 0 : index
    %c0_7 = arith.constant 0 : index
    %17 = vector.load %arg9[%c0_6, %c0_7] : memref<8x128xf32, #tpu.memory_space<vmem>>, vector<8x128xf32>
    tpu.vector_store %arg9[%c0_6, %c0_7], %16 {strides = array<i32>} : memref<8x128xf32, #tpu.memory_space<vmem>>, vector<8x128xf32>,
    %c0_i32_8 = arith.constant 0 : i32
    %18 = arith.cmpi eq, %arg1, %c0_i32_8 : i32
    %19 = arith.extui %18 : i1 to i32
    %c0_i32_9 = arith.constant 0 : i32
    %20 = arith.cmpi ne, %19, %c0_i32_9 : i32
    scf.if %20 {
      %c0_10 = arith.constant 0 : index
      %c0_11 = arith.constant 0 : index
      %21 = vector.load %arg9[%c0_10, %c0_11] : memref<8x128xf32, #tpu.memory_space<vmem>>, vector<8x128xf32>
      %22 = vector.extract_strided_slice %21 {offsets = [0, 0], sizes = [8, 32], strides = [1, 1]} : vector<8x128xf32> to vector<8x32xf32>
      %23 = vector.extract_strided_slice %21 {offsets = [0, 32], sizes = [8, 1], strides = [1, 1]} : vector<8x128xf32> to vector<8x1xf32>
      %cst_12 = arith.constant 1.000000e+00 : f32
      %24 = vector.broadcast %cst_12 : f32 to vector<8x1xf32>
      %25 = arith.maximumf %23, %24 : vector<8x1xf32>
      %26 = tpu.reciprocal %25 {approx = true} : vector<8x1xf32> -> vector<8x1xf32>
      %27 = vector.broadcast %26 : vector<8x1xf32> to vector<8x32xf32>
      %28 = arith.mulf %22, %27 : vector<8x32xf32>
      %c0_13 = arith.constant 0 : index
      %c0_14 = arith.constant 0 : index
      %29 = vector.load %arg4[%c0_13, %c0_14] : memref<8x32xf32, #tpu.memory_space<vmem>>, vector<8x32xf32>
      %30 = arith.truncf %28 : vector<8x32xf32> to vector<8x32xbf16>
      %c0_15 = arith.constant 0 : index
      %c0_16 = arith.constant 0 : index
      %31 = vector.load %arg5[%c0_15, %c0_16] : memref<32x32xbf16, #tpu.memory_space<vmem>>, vector<32x32xbf16>
      %cst_17 = arith.constant dense<0.000000e+00> : vector<8x32xf32>
      %32 = tpu.matmul %30, %31, %cst_17 {dimension_numbers = #tpu.dot_dimension_numbers<[1], [0], [0], [1], [0, 0, 1, 1], [], []>} : vector<8x32xbf16>, vector<32x32xbf16>, vector<8x32xf32> -> vector<8x32xf32>
      %33 = arith.addf %29, %32 : vector<8x32xf32>
      %cst_18 = arith.constant 0.000000e+00 : f32
      %34 = vector.broadcast %cst_18 : f32 to vector<8x32xf32>
      %35 = arith.maximumf %33, %34 : vector<8x32xf32>
      %36 = arith.truncf %35 : vector<8x32xf32> to vector<8x32xbf16>
      %c0_19 = arith.constant 0 : index
      %c0_20 = arith.constant 0 : index
      %37 = vector.load %arg6[%c0_19, %c0_20] : memref<32x128xbf16, #tpu.memory_space<vmem>>, vector<32x128xbf16>
      %cst_21 = arith.constant dense<0.000000e+00> : vector<8x128xf32>
      %38 = tpu.matmul %36, %37, %cst_21 {dimension_numbers = #tpu.dot_dimension_numbers<[1], [0], [0], [1], [0, 0, 1, 1], [], []>} : vector<8x32xbf16>, vector<32x128xbf16>, vector<8x128xf32> -> vector<8x128xf32>
      %c0_22 = arith.constant 0 : index
      %c0_23 = arith.constant 0 : index
      %39 = vector.load %arg7[%c0_22, %c0_23] : memref<1x128xf32, #tpu.memory_space<vmem>>, vector<1x128xf32>
      %40 = vector.broadcast %39 : vector<1x128xf32> to vector<8x128xf32>
      %41 = arith.addf %38, %40 : vector<8x128xf32>
      %c0_24 = arith.constant 0 : index
      %c0_25 = arith.constant 0 : index
      %42 = vector.load %arg8[%c0_24, %c0_25] : memref<8x128xf32, #tpu.memory_space<vmem>>, vector<8x128xf32>
      tpu.vector_store %arg8[%c0_24, %c0_25], %41 {strides = array<i32>} : memref<8x128xf32, #tpu.memory_space<vmem>>, vector<8x128xf32>,
    } else {
    }
    return
  }
  func.func @transform_0(%arg0: i32, %arg1: i32) -> (i32, i32) {
    %c0_i32 = arith.constant 0 : i32
    %c0_i32_0 = arith.constant 0 : i32
    return %arg1, %c0_i32 : i32, i32
  }
  func.func @transform_1(%arg0: i32, %arg1: i32) -> (i32, i32) {
    %c0_i32 = arith.constant 0 : i32
    %c0_i32_0 = arith.constant 0 : i32
    return %c0_i32, %arg1 : i32, i32
  }
  func.func @transform_2(%arg0: i32, %arg1: i32) -> (i32, i32) {
    %c0_i32 = arith.constant 0 : i32
    %c0_i32_0 = arith.constant 0 : i32
    return %arg0, %c0_i32 : i32, i32
  }
  func.func @transform_3(%arg0: i32, %arg1: i32) -> (i32, i32) {
    %c0_i32 = arith.constant 0 : i32
    %c0_i32_0 = arith.constant 0 : i32
    %c0_i32_1 = arith.constant 0 : i32
    return %c0_i32, %c0_i32_0 : i32, i32
  }
  func.func @transform_4(%arg0: i32, %arg1: i32) -> (i32, i32) {
    %c0_i32 = arith.constant 0 : i32
    %c0_i32_0 = arith.constant 0 : i32
    %c0_i32_1 = arith.constant 0 : i32
    return %c0_i32, %c0_i32_0 : i32, i32
  }
  func.func @transform_5(%arg0: i32, %arg1: i32) -> (i32, i32) {
    %c0_i32 = arith.constant 0 : i32
    %c0_i32_0 = arith.constant 0 : i32
    %c0_i32_1 = arith.constant 0 : i32
    return %c0_i32, %c0_i32_0 : i32, i32
  }
  func.func @transform_6(%arg0: i32, %arg1: i32) -> (i32, i32) {
    %c0_i32 = arith.constant 0 : i32
    %c0_i32_0 = arith.constant 0 : i32
    return %arg0, %c0_i32 : i32, i32
  }
}

</mosaic_0001>

<bundles_post_ra>
// kernel: node_model_forward.3
= control target key start
LH: loop header
LB: loop body
LE: loop exit
PB: predicated region body
PF: predicated region fallthrough
CT: control target
= control target key end

     0   :  { %s1091_s21 = smov 0   ;;  %s1093_s22 = smov 0   ;;  %s1239_s0 = inlined_call_operand.vmem [shape: bf16[384,128], index: 0, kind: input, shape index: {}]   ;;  %s1240_s1 = inlined_call_operand.vmem [shape: s32[1,384], index: 1, kind: input, shape index: {}]   ;;  %s1241_s2 = inlined_call_operand.vmem [shape: f32[16,32], index: 2, kind: input, shape index: {}]   ;;  %s1242_s3 = inlined_call_operand.vmem [shape: bf16[32,32], index: 3, kind: input, shape index: {}]   ;;  %s1243_s4 = inlined_call_operand.vmem [shape: bf16[32,128], index: 4, kind: input, shape index: {}]   ;;  %s1244_s5 = inlined_call_operand.vmem [shape: f32[1,128], index: 5, kind: input, shape index: {}]   ;;  %s1245_s6 = inlined_call_operand.vmem [shape: f32[16,128], index: 6, kind: output, shape index: {}]  }
   0x1   :  { %s1095_s23 = smov 0  }
   0x2 LB: > { %s28_s24 = sadd.s32 1, %s1046_s22  ;;  %p850_p0 = scmp.ge.s32.totalorder %s1050_s23, 1  ;;  %s1050_s23 = sphi %s1095_s23, %s16_s23   ;;  %s1046_s22 = sphi %s1093_s22, %s1247_s22   ;;  %s1042_s21 = sphi %s1091_s21, %s1246_s21  }
   0x3   : > { %p30_p1 = scmp.ge.s32.totalorder %s28_s24, 2  ;;  %p244_p2 = scmp.lt.s32.totalorder %s1050_s23, 3 }
   0x5   : > { %s1249_s24 = smov (%p30_p1, %s28_s24), 0  ;;  %p245_p3 = pnand %p850_p0, %p244_p2 }
   0x6   : > { %s853_s13 = sshll.u32 (!%p245_p3), %s1042_s21, 3  ;;  %p292_p4 = scmp.lt.s32.totalorder (!%p245_p3), %s1042_s21, 1 }
   0x7   : > { %248 = sbr.rel (%p245_p3) target bundleno = 787 (0x313), region = 44 }
   0xc   : > { %v998_v0 = vld [vmem:[%s1239_s0 + $0x78] sm:$0xff]   ;;  %v1052_v1 = vmov 0.0   ;;  %vm1053_vm0 = vmmov 0   ;;  %v1001_v4 = vld [vmem:[%s1239_s0 + $0x70] sm:$0xff]   ;;  %v1004_v7 = vld [vmem:[%s1239_s0 + $0x68] sm:$0xff]   ;;  %v307_v12 = vlaneseq  ;;  %v309_v23 = vstv %s853_s13  ;;  %s1251_s21 = smov (!%p292_p4, %s1042_s21), 1 }
   0xd   : > { %933 = vmatprep.subr.bf16.mxu1 %v1052_v1  ;;  %v999_v2 = vld [vmem:[%s1239_s0 + $0xb8] sm:$0xff]   ;;  %896 = vmatprep.subr.bf16.mxu0 %v998_v0  ;;  %v1002_v5 = vld [vmem:[%s1239_s0 + $0xb0] sm:$0xff]   ;;  %v1005_v8 = vld [vmem:[%s1239_s0 + $0xa8] sm:$0xff]   ;;  %v1054_v36 = vmov 1.0|1.0   ;;  %v1055_v37 = vmov 32  }
   0xe   : > { %v1000_v3 = vld [vmem:[%s1239_s0 + $0x38] sm:$0xff]   ;;  %949 = vmatprep.mubr.msk.bf16.mxu1 %vm1053_vm0, %v1052_v1  ;;  %934 = vmatpush3.bf16.msra.mxu1 %v999_v2  ;;  %v1003_v6 = vld [vmem:[%s1239_s0 + $0x30] sm:$0xff]   ;;  %v1006_v9 = vld [vmem:[%s1239_s0 + $0x28] sm:$0xff]   ;;  %v308_v16 = vshrl.u32 %v307_v12, 7  ;;  %vm641_vm7 = vcmask 261120   ;;  %s851_s20 = sshll.u32 %s1251_s21, 3 }
   0xf   : > { %897 = vmatpush3.bf16.msra.mxu0 %v1000_v3  ;;  %935 = vmatprep.subr.bf16.mxu1 %v1052_v1  ;;  %v1007_v10 = vld [vmem:[%s1239_s0 + $0x60] sm:$0xff]   ;;  %v1010_v14 = vld [vmem:[%s1239_s0 + $0x58] sm:$0xff]   ;;  %v1013_v18 = vld [vmem:[%s1239_s0 + $0x50] sm:$0xff]   ;;  %s295_s27 = scalar_lea.vmem %s1241_s2, %s851_s20  ;;  %s299_s7 = scalar_lea.vmem %s1245_s6, %s851_s20 }
  0x10   : > { %898 = vmatprep.subr.bf16.mxu0 %v1001_v4  ;;  %v1008_v11 = vld [vmem:[%s1239_s0 + $0xa0] sm:$0xff]   ;;  %v1011_v15 = vld [vmem:[%s1239_s0 + $0x98] sm:$0xff]   ;;  %v1014_v19 = vld [vmem:[%s1239_s0 + $0x90] sm:$0xff]   ;;  %v318_v21 = vsub.s32 1, %v308_v16  ;;  %v322_v24 = vsub.s32 2, %v308_v16  ;;  %v314_v26 = vsub.s32 0, %v308_v16  ;;  %v310_v29 = vadd.s32 %v309_v23, %v308_v16  ;;  %997 = vset.pattern.permute.xlu0 %v1055_v37 }
  0x11   : > { %v1009_v13 = vld [vmem:[%s1239_s0 + $0x20] sm:$0xff]   ;;  %v1012_v17 = vld [vmem:[%s1239_s0 + $0x18] sm:$0xff]   ;;  %v1015_v20 = vld [vmem:[%s1239_s0 + $0x10] sm:$0xff]  }
  0x12   : > { %936 = vmatpush3.bf16.msra.mxu1 %v1002_v5  ;;  %v1016_v22 = vld [vmem:[%s1239_s0 + $0x48] sm:$0xff]   ;;  %v1019_v28 = vld [vmem:[%s1239_s0 + $0x40] sm:$0xff]  }
  0x13   : > { %899 = vmatpush3.bf16.msra.mxu0 %v1003_v6  ;;  %937 = vmatprep.subr.bf16.mxu1 %v1052_v1  ;;  %v1017_v25 = vld [vmem:[%s1239_s0 + $0x88] sm:$0xff]   ;;  %v311_v30 = vld [vmem:[%s1240_s1] sm:$0x7] }
  0x14   : > { %900 = vmatprep.subr.bf16.mxu0 %v1004_v7  ;;  %v1018_v27 = vld [vmem:[%s1239_s0 + $0x8] sm:$0xff]   ;;  %v319_v31 = vrot.slane %v311_v30, %v318_v21  ;;  %v323_v32 = vrot.slane %v311_v30, %v322_v24  ;;  %v315_v33 = vrot.slane %v311_v30, %v314_v26  ;;  %v1020_v34 = vld [vmem:[%s1239_s0 + $0x80] sm:$0xff]  }
  0x15   : > { %v1021_v35 = vld [vmem:[%s1239_s0] sm:$0xff]   ;;  %v1022_v38 = vld [vmem:[%s1242_s3 + $0x8] sm:$0xff]  }
  0x16   : > { %938 = vmatpush3.bf16.msra.mxu1 %v1005_v8  ;;  %vm325_vm1 = vcmp.eq.s32.totalorder %v310_v29, %v319_v31  ;;  %vm326_vm3 = vcmp.eq.s32.totalorder %v310_v29, %v323_v32  ;;  %vm324_vm4 = vcmp.eq.s32.totalorder %v310_v29, %v315_v33  ;;  %v1023_v50 = vld [vmem:[%s1242_s3] sm:$0xff]   ;;  %v1024_v52 = vld [vmem:[%s1243_s4 + $0x8] sm:$0xff]  }
  0x17   : > { %901 = vmatpush3.bf16.msra.mxu0 %v1006_v9  ;;  %939 = vmatprep.subr.bf16.mxu1 %v1052_v1  ;;  %vm881_vm2 = vmpackc.low %vm325_vm1, %vm325_vm1  ;;  %v1025_v56 = vld [vmem:[%s1243_s4] sm:$0xff]  }
  0x18   : > { %902 = vmatprep.subr.bf16.mxu0 %v1007_v10  ;;  %882 = vmatprep.mubr.msk.bf16.mxu0 %vm881_vm2, %v1054_v36  ;;  %vm885_vm5 = vmpackc.low %vm326_vm3, %vm326_vm3  ;;  %v623_v57 = vld [vmem:[%s295_s27] sm:$0xff] }
  0x19   : > { %vm883_vm6 = vmpackc.low %vm324_vm4, %vm324_vm4 }
  0x1a   : > { %940 = vmatpush3.bf16.msra.mxu1 %v1008_v11 }
  0x1b   : > { %903 = vmatpush3.bf16.msra.mxu0 %v1009_v13  ;;  %941 = vmatprep.subr.bf16.mxu1 %v1052_v1 }
  0x1c   : > { %904 = vmatprep.subr.bf16.mxu0 %v1010_v14 }
  0x1e   : > { %942 = vmatpush3.bf16.msra.mxu1 %v1011_v15 }
  0x1f   : > { %905 = vmatpush3.bf16.msra.mxu0 %v1012_v17  ;;  %943 = vmatprep.subr.bf16.mxu1 %v1052_v1 }
  0x20   : > { %906 = vmatprep.subr.bf16.mxu0 %v1013_v18 }
  0x22   : > { %944 = vmatpush3.bf16.msra.mxu1 %v1014_v19 }
  0x23   : > { %907 = vmatpush3.bf16.msra.mxu0 %v1015_v20  ;;  %945 = vmatprep.subr.bf16.mxu1 %v1052_v1 }
  0x24   : > { %908 = vmatprep.subr.bf16.mxu0 %v1016_v22 }
  0x26   : > { %946 = vmatpush3.bf16.msra.mxu1 %v1017_v25 }
  0x27   : > { %909 = vmatpush3.bf16.msra.mxu0 %v1018_v27  ;;  %947 = vmatprep.subr.bf16.mxu1 %v1052_v1 }
  0x28   : > { %910 = vmatprep.subr.bf16.mxu0 %v1019_v28 }
  0x2a   : > { %948 = vmatpush3.bf16.msra.mxu1 %v1020_v34 }
  0x2b   : > { %911 = vmatpush3.bf16.msra.mxu0 %v1021_v35  ;;  %961 = vmatprep.subr.bf16.mxu1 %v1052_v1 }
  0x2c   : > { %953 = vmatprep.subr.bf16.mxu0 %v1052_v1 }
  0x2d   : > { %950 = vmatmul.mubr.msk.bf16.vlgmr.msra.gmra.mxu1 %vm885_vm5, %v1054_v36 }
  0x2e   : > { %884 = vmatmul.mubr.msk.bf16.vlgmr.msra.gmra.mxu0 %vm883_vm6, %v1054_v36  ;;  %965 = vmatprep.mubr.msk.bf16.mxu1 %vm1053_vm0, %v1052_v1 }
  0x2f   : > { %957 = vmatprep.mubr.msk.bf16.mxu0 %vm1053_vm0, %v1052_v1  ;;  %954 = vmatpush3.bf16.msra.mxu0 %v1022_v38 }
  0x30   : > { %955 = vmatprep.subr.bf16.mxu0 %v1052_v1  ;;  %962 = vmatpush3.bf16.msra.mxu1 %v1024_v52 }
  0x31   : > { %963 = vmatprep.subr.bf16.mxu1 %v1052_v1  ;;  %v890_v1 = vld [vmem:[%s1244_s5] ss:$0 sm:$0xff] }
  0x33   : > { %956 = vmatpush3.bf16.msra.mxu0 %v1023_v50 }
  0x34   : > { %964 = vmatpush3.bf16.msra.mxu1 %v1025_v56 }
  0xed   : > { %v603_v39 = vpop.f32.mrf.mxu1 }
  0xee   : > { %v912_v40 = vpop.f32.mrf.mxu0 }
  0xef   : > { %v951_v41 = vpop.f32.mrf.mxu1 }
  0xf0   : > { %v913_v42 = vpop.f32.mrf.mxu0 }
  0xf1   : > { %v914_v43 = vadd.f32 %v913_v42, %v912_v40  ;;  %v606_v44 = vpop.f32.mrf.mxu1 }
  0xf2   : > { %v915_v45 = vpop.f32.mrf.mxu0 }
  0xf3   : > { %v604_v46 = vadd.f32 %v914_v43, %v603_v39  ;;  %v952_v47 = vpop.f32.mrf.mxu1 }
  0xf4   : > { %v916_v48 = vpop.f32.mrf.mxu0 }
  0xf5   : > { %v615_v49 = vmax.f32 %v604_v46, 1.0 }
  0xf7   : > { %1026 = vrcp.f32 %v615_v49 }
 0x104   : > { %v1027_v51 = vpop.eup %1026 }
 0x105   : > { %619 = vperm.xlu0 %997, %v1027_v51  }
 0x180   : > { %v620_v53 = vpop.permute.xlu0 %619 }
 0x181   : > { %v622_v54 = vmul.f32 %v620_v53, %v604_v46 }
 0x183   : > { %v624_v55 = vpack.c.bf16 %v622_v54, %v622_v54 }
 0x185   : > { %958 = vmatmul.mubr.msk.bf16.vlgmr.msra.gmra.mxu0 %vm641_vm7, %v624_v55 }
 0x245   : > { %v679_v58 = vpop.f32.mrf.mxu0 }
 0x246   : > { %v685_v59 = vadd.f32 %v679_v58, %v623_v57 }
 0x247   : > { %v959_v60 = vpop.f32.mrf.mxu0 }
 0x248   : > { %v686_v61 = vmax.f32 %v685_v59, 0.0 }
 0x249   : > { %v682_v62 = vpop.f32.mrf.mxu0 }
 0x24a   : > { %v687_v63 = vpack.c.bf16 %v686_v61, %v686_v61 }
 0x24b   : > { %v960_v0 = vpop.f32.mrf.mxu0 }
 0x24c   : > { %966 = vmatmul.mubr.msk.bf16.vlgmr.msra.gmra.mxu1 %vm641_vm7, %v687_v63 }
 0x30c   : > { %v748_v2 = vpop.f32.mrf.mxu1 }
 0x30d   : > { %v749_v3 = vadd.f32 %v890_v1, %v748_v2 }
 0x30e   : > { %v967_v4 = vpop.f32.mrf.mxu1 }
 0x30f   : > { %754 = vst [vmem:[%s299_s7] sm:$0xff] %v749_v3 }
 0x310   : > { %v751_v5 = vpop.f32.mrf.mxu1 }
 0x312   : > { %v968_v6 = vpop.f32.mrf.mxu1 }
 0x313 PF: > { %s16_s23 = sadd.s32 1, %s1050_s23   ;;  %s1246_s21 = smov %s1046_s22 }
 0x314   : > { %p13_p5 = scmp.ge.s32.totalorder %s16_s23, 4   ;;  %s1247_s22 = smov %s1249_s24 }
 0x316   :  { %15 = sbr.rel (!%p13_p5) target bundleno = 2 (0x2), region = 88 }

// kernel: node_model_forward.2
= control target key start
LH: loop header
LB: loop body
LE: loop exit
PB: predicated region body
PF: predicated region fallthrough
CT: control target
= control target key end

     0   :  { %vm289_vm0 = vcmask 1041408   ;;  %vm216_vm1 = vcmask 293888   ;;  %vm613_vm2 = vcmask 261120   ;;  %s2005_s1 = inlined_call_operand.vmem [shape: bf16[36,32], index: 1, kind: input, shape index: {}]   ;;  %s2006_s0 = inlined_call_operand.vmem [shape: bf16[384,36], index: 0, kind: input, shape index: {}]   ;;  %s2007_s3 = inlined_call_operand.vmem [shape: bf16[32,128], index: 3, kind: input, shape index: {}]   ;;  %s2008_s2 = inlined_call_operand.vmem [shape: f32[1,32], index: 2, kind: input, shape index: {}]   ;;  %s2009_s4 = inlined_call_operand.vmem [shape: f32[1,128], index: 4, kind: input, shape index: {}]   ;;  %s2010_s5 = inlined_call_operand.vmem [shape: bf16[384,128], index: 5, kind: output, shape index: {}]  }
   0x1   :  { %v1633_v0 = vld [vmem:[%s2005_s1 + $0x10] ss:$0 sps:$4 sm:$0x33]   ;;  %v1634_v1 = vld [vmem:[%s2005_s1 + $0x8] sm:$0xff]   ;;  %v1636_v3 = vld [vmem:[%s2006_s0] sm:$0xff]  }
   0x2   :  { %1632 = vmatprep.subr.msk.bf16.mxu0 %vm289_vm0, %v1633_v0  ;;  %v291_v2 = vsel %vm289_vm0, %v1633_v0, 0  ;;  %v1635_v4 = vld [vmem:[%s2005_s1] sm:$0xff]   ;;  %1532 = vmatprep.mubr.msk.bf16.mxu0 %vm216_vm1, %v1636_v3  ;;  %v1637_v5 = vld [vmem:[%s2006_s0 + $0x8] sm:$0xff]   ;;  %v1638_v6 = vld [vmem:[%s2006_s0 + $0x10] sm:$0xff]  }
   0x3   :  { %1527 = vmatpush3.bf16.msra.mxu0 %v291_v2  ;;  %v1639_v7 = vld [vmem:[%s2006_s0 + $0x18] sm:$0xff]   ;;  %v1640_v8 = vld [vmem:[%s2006_s0 + $0x20] sm:$0xff]   ;;  %v1641_v9 = vld [vmem:[%s2006_s0 + $0x28] sm:$0xff]  }
   0x4   :  { %1528 = vmatprep.subr.bf16.mxu0 %v1634_v1  ;;  %v1642_v10 = vld [vmem:[%s2006_s0 + $0x30] sm:$0xff]   ;;  %v1643_v11 = vld [vmem:[%s2006_s0 + $0x38] sm:$0xff]   ;;  %v1644_v12 = vld [vmem:[%s2006_s0 + $0x40] sm:$0xff]  }
   0x5   :  { %v1645_v13 = vld [vmem:[%s2006_s0 + $0x48] sm:$0xff]   ;;  %v1646_v14 = vld [vmem:[%s2006_s0 + $0x50] sm:$0xff]   ;;  %v1647_v15 = vld [vmem:[%s2006_s0 + $0x58] sm:$0xff]  }
   0x6   :  { %v1648_v16 = vld [vmem:[%s2006_s0 + $0x60] sm:$0xff]   ;;  %v1649_v17 = vld [vmem:[%s2006_s0 + $0x68] sm:$0xff]   ;;  %v1650_v18 = vld [vmem:[%s2006_s0 + $0x70] sm:$0xff]  }
   0x7   :  { %1529 = vmatpush3.bf16.msra.mxu0 %v1634_v1  ;;  %v1651_v19 = vld [vmem:[%s2006_s0 + $0x78] sm:$0xff]   ;;  %v1652_v20 = vld [vmem:[%s2006_s0 + $0x80] sm:$0xff]   ;;  %v1653_v21 = vld [vmem:[%s2006_s0 + $0x88] sm:$0xff]  }
   0x8   :  { %1530 = vmatprep.subr.bf16.mxu0 %v1635_v4  ;;  %v1654_v22 = vld [vmem:[%s2006_s0 + $0x90] sm:$0xff]   ;;  %v1655_v23 = vld [vmem:[%s2006_s0 + $0x98] sm:$0xff]   ;;  %v1660_v24 = vld [vmem:[%s2007_s3 + $0x8] sm:$0xff]  }
   0x9   :  { %v1656_v25 = vld [vmem:[%s2006_s0 + $0xa0] sm:$0xff]   ;;  %1580 = vmatprep.subr.bf16.mxu1 %v1660_v24  ;;  %v1657_v27 = vld [vmem:[%s2006_s0 + $0xa8] sm:$0xff]   ;;  %v1658_v28 = vld [vmem:[%s2006_s0 + $0xb0] sm:$0xff]  }
   0xa   :  { %1581 = vmatpush3.bf16.msra.mxu1 %v1660_v24  ;;  %v1661_v26 = vld [vmem:[%s2007_s3] sm:$0xff]   ;;  %v1659_v29 = vld [vmem:[%s2006_s0 + $0xb8] sm:$0xff]  }
   0xb   :  { %1531 = vmatpush3.bf16.msra.mxu0 %v1635_v4  ;;  %1582 = vmatprep.subr.bf16.mxu1 %v1661_v26  ;;  %v1806_v32 = vld [vmem:[%s2008_s2] ss:$0 sm:$0xff] }
   0xe   :  { %1533 = vmatmul.mubr.msk.bf16.vlgmr.msra.gmra.mxu0 %vm216_vm1, %v1637_v5  ;;  %1583 = vmatpush3.bf16.msra.mxu1 %v1661_v26 }
   0xf   :  { %1536 = vmatprep.mubr.msk.bf16.mxu0 %vm216_vm1, %v1638_v6 }
  0x16   :  { %1537 = vmatmul.mubr.msk.bf16.gmra.mxu0 %vm216_vm1, %v1639_v7 }
  0x17   :  { %1540 = vmatprep.mubr.msk.bf16.mxu0 %vm216_vm1, %v1640_v8 }
  0x1e   :  { %1541 = vmatmul.mubr.msk.bf16.gmra.mxu0 %vm216_vm1, %v1641_v9 }
  0x1f   :  { %1544 = vmatprep.mubr.msk.bf16.mxu0 %vm216_vm1, %v1642_v10 }
  0x26   :  { %1545 = vmatmul.mubr.msk.bf16.gmra.mxu0 %vm216_vm1, %v1643_v11 }
  0x27   :  { %1548 = vmatprep.mubr.msk.bf16.mxu0 %vm216_vm1, %v1644_v12 }
  0x2e   :  { %1549 = vmatmul.mubr.msk.bf16.gmra.mxu0 %vm216_vm1, %v1645_v13 }
  0x2f   :  { %1552 = vmatprep.mubr.msk.bf16.mxu0 %vm216_vm1, %v1646_v14 }
  0x36   :  { %1553 = vmatmul.mubr.msk.bf16.gmra.mxu0 %vm216_vm1, %v1647_v15 }
  0x37   :  { %1556 = vmatprep.mubr.msk.bf16.mxu0 %vm216_vm1, %v1648_v16 }
  0x3e   :  { %1557 = vmatmul.mubr.msk.bf16.gmra.mxu0 %vm216_vm1, %v1649_v17 }
  0x3f   :  { %1560 = vmatprep.mubr.msk.bf16.mxu0 %vm216_vm1, %v1650_v18 }
  0x46   :  { %1561 = vmatmul.mubr.msk.bf16.gmra.mxu0 %vm216_vm1, %v1651_v19 }
  0x47   :  { %1564 = vmatprep.mubr.msk.bf16.mxu0 %vm216_vm1, %v1652_v20 }
  0x4e   :  { %1565 = vmatmul.mubr.msk.bf16.gmra.mxu0 %vm216_vm1, %v1653_v21 }
  0x4f   :  { %1568 = vmatprep.mubr.msk.bf16.mxu0 %vm216_vm1, %v1654_v22 }
  0x56   :  { %1569 = vmatmul.mubr.msk.bf16.gmra.mxu0 %vm216_vm1, %v1655_v23 }
  0x57   :  { %1572 = vmatprep.mubr.msk.bf16.mxu0 %vm216_vm1, %v1656_v25 }
  0x5e   :  { %1573 = vmatmul.mubr.msk.bf16.gmra.mxu0 %vm216_vm1, %v1657_v27 }
  0x5f   :  { %1576 = vmatprep.mubr.msk.bf16.mxu0 %vm216_vm1, %v1658_v28 }
  0x66   :  { %1577 = vmatmul.mubr.msk.bf16.gmra.mxu0 %vm216_vm1, %v1659_v29 }
  0xce   :  { %v1534_v30 = vpop.f32.mrf.mxu0 }
  0xcf   :  { %v336_v36 = vadd.f32 %v1534_v30, %v1806_v32 }
  0xd0   :  { %v327_v31 = vpop.f32.mrf.mxu0 }
  0xd1   :  { %v328_v34 = vadd.f32 %v1806_v32, %v327_v31  ;;  %v520_v43 = vmax.f32 %v336_v36, 0.0 }
  0xd2   :  { %v1535_v33 = vpop.f32.mrf.mxu0 }
  0xd3   :  { %v339_v35 = vadd.f32 %v1535_v33, %v1806_v32  ;;  %v518_v41 = vmax.f32 %v328_v34, 0.0 }
  0xd4   :  { %v330_v37 = vpop.f32.mrf.mxu0 }
  0xd5   :  { %v331_v38 = vadd.f32 %v1806_v32, %v330_v37  ;;  %v521_v39 = vmax.f32 %v339_v35, 0.0 }
  0xd6   :  { %v1538_v40 = vpop.f32.mrf.mxu0 }
  0xd7   :  { %v519_v42 = vmax.f32 %v331_v38, 0.0  ;;  %v567_v46 = vpack.c.bf16 %v521_v39, %v520_v43  ;;  %v352_v50 = vadd.f32 %v1538_v40, %v1806_v32 }
  0xd8   :  { %v343_v44 = vpop.f32.mrf.mxu0 }
  0xd9   :  { %v566_v45 = vpack.c.bf16 %v519_v42, %v518_v41  ;;  %v344_v48 = vadd.f32 %v1806_v32, %v343_v44  ;;  %v524_v57 = vmax.f32 %v352_v50, 0.0 }
  0xda   :  { %v1539_v47 = vpop.f32.mrf.mxu0 }
  0xdb   :  { %v355_v49 = vadd.f32 %v1539_v47, %v1806_v32  ;;  %1584 = vmatprep.mubr.msk.bf16.mxu1 %vm613_vm2, %v566_v45  ;;  %v522_v55 = vmax.f32 %v344_v48, 0.0 }
  0xdc   :  { %v346_v51 = vpop.f32.mrf.mxu0  ;;  %1585 = vmatmul.mubr.msk.bf16.vlgmr.msra.gmra.mxu1 %vm613_vm2, %v567_v46 }
  0xdd   :  { %v347_v52 = vadd.f32 %v1806_v32, %v346_v51  ;;  %v525_v53 = vmax.f32 %v355_v49, 0.0 }
  0xde   :  { %v1542_v54 = vpop.f32.mrf.mxu0 }
  0xdf   :  { %v523_v56 = vmax.f32 %v347_v52, 0.0  ;;  %v569_v60 = vpack.c.bf16 %v525_v53, %v524_v57  ;;  %v368_v0 = vadd.f32 %v1542_v54, %v1806_v32 }
  0xe0   :  { %v359_v58 = vpop.f32.mrf.mxu0 }
  0xe1   :  { %v568_v59 = vpack.c.bf16 %v523_v56, %v522_v55  ;;  %v360_v62 = vadd.f32 %v1806_v32, %v359_v58  ;;  %v528_v7 = vmax.f32 %v368_v0, 0.0 }
  0xe2   :  { %v1543_v61 = vpop.f32.mrf.mxu0 }
  0xe3   :  { %v371_v63 = vadd.f32 %v1543_v61, %v1806_v32  ;;  %1588 = vmatprep.mubr.msk.bf16.mxu1 %vm613_vm2, %v568_v59  ;;  %v526_v5 = vmax.f32 %v360_v62, 0.0 }
  0xe4   :  { %v362_v1 = vpop.f32.mrf.mxu0  ;;  %1589 = vmatmul.mubr.msk.bf16.gmra.mxu1 %vm613_vm2, %v569_v60 }
  0xe5   :  { %v363_v2 = vadd.f32 %v1806_v32, %v362_v1  ;;  %v529_v3 = vmax.f32 %v371_v63, 0.0 }
  0xe6   :  { %v1546_v4 = vpop.f32.mrf.mxu0 }
  0xe7   :  { %v527_v6 = vmax.f32 %v363_v2, 0.0  ;;  %v571_v10 = vpack.c.bf16 %v529_v3, %v528_v7  ;;  %v384_v14 = vadd.f32 %v1546_v4, %v1806_v32 }
  0xe8   :  { %v375_v8 = vpop.f32.mrf.mxu0 }
  0xe9   :  { %v570_v9 = vpack.c.bf16 %v527_v6, %v526_v5  ;;  %v376_v12 = vadd.f32 %v1806_v32, %v375_v8  ;;  %v532_v21 = vmax.f32 %v384_v14, 0.0 }
  0xea   :  { %v1547_v11 = vpop.f32.mrf.mxu0 }
  0xeb   :  { %v387_v13 = vadd.f32 %v1547_v11, %v1806_v32  ;;  %1592 = vmatprep.mubr.msk.bf16.mxu1 %vm613_vm2, %v570_v9  ;;  %v530_v19 = vmax.f32 %v376_v12, 0.0 }
  0xec   :  { %v378_v15 = vpop.f32.mrf.mxu0  ;;  %1593 = vmatmul.mubr.msk.bf16.gmra.mxu1 %vm613_vm2, %v571_v10 }
  0xed   :  { %v379_v16 = vadd.f32 %v1806_v32, %v378_v15  ;;  %v533_v17 = vmax.f32 %v387_v13, 0.0 }
  0xee   :  { %v1550_v18 = vpop.f32.mrf.mxu0 }
  0xef   :  { %v531_v20 = vmax.f32 %v379_v16, 0.0  ;;  %v573_v24 = vpack.c.bf16 %v533_v17, %v532_v21  ;;  %v400_v28 = vadd.f32 %v1550_v18, %v1806_v32 }
  0xf0   :  { %v391_v22 = vpop.f32.mrf.mxu0 }
  0xf1   :  { %v572_v23 = vpack.c.bf16 %v531_v20, %v530_v19  ;;  %v392_v26 = vadd.f32 %v1806_v32, %v391_v22  ;;  %v536_v36 = vmax.f32 %v400_v28, 0.0 }
  0xf2   :  { %v1551_v25 = vpop.f32.mrf.mxu0 }
  0xf3   :  { %v403_v27 = vadd.f32 %v1551_v25, %v1806_v32  ;;  %1596 = vmatprep.mubr.msk.bf16.mxu1 %vm613_vm2, %v572_v23  ;;  %v534_v34 = vmax.f32 %v392_v26, 0.0 }
  0xf4   :  { %v394_v29 = vpop.f32.mrf.mxu0  ;;  %1597 = vmatmul.mubr.msk.bf16.gmra.mxu1 %vm613_vm2, %v573_v24 }
  0xf5   :  { %v395_v30 = vadd.f32 %v1806_v32, %v394_v29  ;;  %v537_v31 = vmax.f32 %v403_v27, 0.0 }
  0xf6   :  { %v1554_v33 = vpop.f32.mrf.mxu0 }
  0xf7   :  { %v535_v35 = vmax.f32 %v395_v30, 0.0  ;;  %v575_v39 = vpack.c.bf16 %v537_v31, %v536_v36  ;;  %v416_v43 = vadd.f32 %v1554_v33, %v1806_v32 }
  0xf8   :  { %v407_v37 = vpop.f32.mrf.mxu0 }
  0xf9   :  { %v574_v38 = vpack.c.bf16 %v535_v35, %v534_v34  ;;  %v408_v41 = vadd.f32 %v1806_v32, %v407_v37  ;;  %v540_v50 = vmax.f32 %v416_v43, 0.0 }
  0xfa   :  { %v1555_v40 = vpop.f32.mrf.mxu0 }
  0xfb   :  { %v419_v42 = vadd.f32 %v1555_v40, %v1806_v32  ;;  %1600 = vmatprep.mubr.msk.bf16.mxu1 %vm613_vm2, %v574_v38  ;;  %v538_v48 = vmax.f32 %v408_v41, 0.0 }
  0xfc   :  { %v410_v44 = vpop.f32.mrf.mxu0  ;;  %1601 = vmatmul.mubr.msk.bf16.gmra.mxu1 %vm613_vm2, %v575_v39 }
  0xfd   :  { %v411_v45 = vadd.f32 %v1806_v32, %v410_v44  ;;  %v541_v46 = vmax.f32 %v419_v42, 0.0 }
  0xfe   :  { %v1558_v47 = vpop.f32.mrf.mxu0 }
  0xff   :  { %v539_v49 = vmax.f32 %v411_v45, 0.0  ;;  %v577_v53 = vpack.c.bf16 %v541_v46, %v540_v50  ;;  %v432_v57 = vadd.f32 %v1558_v47, %v1806_v32 }
 0x100   :  { %v423_v51 = vpop.f32.mrf.mxu0 }
 0x101   :  { %v576_v52 = vpack.c.bf16 %v539_v49, %v538_v48  ;;  %v424_v55 = vadd.f32 %v1806_v32, %v423_v51  ;;  %v544_v0 = vmax.f32 %v432_v57, 0.0 }
 0x102   :  { %v1559_v54 = vpop.f32.mrf.mxu0 }
 0x103   :  { %v435_v56 = vadd.f32 %v1559_v54, %v1806_v32  ;;  %1604 = vmatprep.mubr.msk.bf16.mxu1 %vm613_vm2, %v576_v52  ;;  %v542_v62 = vmax.f32 %v424_v55, 0.0 }
 0x104   :  { %v426_v58 = vpop.f32.mrf.mxu0  ;;  %1605 = vmatmul.mubr.msk.bf16.gmra.mxu1 %vm613_vm2, %v577_v53 }
 0x105   :  { %v427_v59 = vadd.f32 %v1806_v32, %v426_v58  ;;  %v545_v60 = vmax.f32 %v435_v56, 0.0 }
 0x106   :  { %v1562_v61 = vpop.f32.mrf.mxu0 }
 0x107   :  { %v543_v63 = vmax.f32 %v427_v59, 0.0  ;;  %v579_v3 = vpack.c.bf16 %v545_v60, %v544_v0  ;;  %v448_v7 = vadd.f32 %v1562_v61, %v1806_v32 }
 0x108   :  { %v439_v1 = vpop.f32.mrf.mxu0 }
 0x109   :  { %v578_v2 = vpack.c.bf16 %v543_v63, %v542_v62  ;;  %v440_v5 = vadd.f32 %v1806_v32, %v439_v1  ;;  %v548_v14 = vmax.f32 %v448_v7, 0.0 }
 0x10a   :  { %v1563_v4 = vpop.f32.mrf.mxu0 }
 0x10b   :  { %v451_v6 = vadd.f32 %v1563_v4, %v1806_v32  ;;  %1608 = vmatprep.mubr.msk.bf16.mxu1 %vm613_vm2, %v578_v2  ;;  %v546_v12 = vmax.f32 %v440_v5, 0.0 }
 0x10c   :  { %v442_v8 = vpop.f32.mrf.mxu0  ;;  %1609 = vmatmul.mubr.msk.bf16.gmra.mxu1 %vm613_vm2, %v579_v3 }
 0x10d   :  { %v443_v9 = vadd.f32 %v1806_v32, %v442_v8  ;;  %v549_v10 = vmax.f32 %v451_v6, 0.0 }
 0x10e   :  { %v1566_v11 = vpop.f32.mrf.mxu0 }
 0x10f   :  { %v547_v13 = vmax.f32 %v443_v9, 0.0  ;;  %v581_v17 = vpack.c.bf16 %v549_v10, %v548_v14  ;;  %v464_v21 = vadd.f32 %v1566_v11, %v1806_v32  ;;  %v1883_v10 = vld [vmem:[%s2009_s4] ss:$0 sm:$0xff] }
 0x110   :  { %v455_v15 = vpop.f32.mrf.mxu0 }
 0x111   :  { %v580_v16 = vpack.c.bf16 %v547_v13, %v546_v12  ;;  %v456_v19 = vadd.f32 %v1806_v32, %v455_v15  ;;  %v552_v28 = vmax.f32 %v464_v21, 0.0 }
 0x112   :  { %v1567_v18 = vpop.f32.mrf.mxu0 }
 0x113   :  { %v467_v20 = vadd.f32 %v1567_v18, %v1806_v32  ;;  %1612 = vmatprep.mubr.msk.bf16.mxu1 %vm613_vm2, %v580_v16  ;;  %v550_v26 = vmax.f32 %v456_v19, 0.0 }
 0x114   :  { %v458_v22 = vpop.f32.mrf.mxu0  ;;  %1613 = vmatmul.mubr.msk.bf16.gmra.mxu1 %vm613_vm2, %v581_v17 }
 0x115   :  { %v459_v23 = vadd.f32 %v1806_v32, %v458_v22  ;;  %v553_v24 = vmax.f32 %v467_v20, 0.0 }
 0x116   :  { %v1570_v25 = vpop.f32.mrf.mxu0 }
 0x117   :  { %v551_v27 = vmax.f32 %v459_v23, 0.0  ;;  %v583_v31 = vpack.c.bf16 %v553_v24, %v552_v28  ;;  %v480_v36 = vadd.f32 %v1570_v25, %v1806_v32 }
 0x118   :  { %v471_v29 = vpop.f32.mrf.mxu0 }
 0x119   :  { %v582_v30 = vpack.c.bf16 %v551_v27, %v550_v26  ;;  %v472_v34 = vadd.f32 %v1806_v32, %v471_v29  ;;  %v556_v43 = vmax.f32 %v480_v36, 0.0 }
 0x11a   :  { %v1571_v33 = vpop.f32.mrf.mxu0 }
 0x11b   :  { %v483_v35 = vadd.f32 %v1571_v33, %v1806_v32  ;;  %1616 = vmatprep.mubr.msk.bf16.mxu1 %vm613_vm2, %v582_v30  ;;  %v554_v41 = vmax.f32 %v472_v34, 0.0 }
 0x11c   :  { %v474_v37 = vpop.f32.mrf.mxu0  ;;  %1617 = vmatmul.mubr.msk.bf16.gmra.mxu1 %vm613_vm2, %v583_v31 }
 0x11d   :  { %v475_v38 = vadd.f32 %v1806_v32, %v474_v37  ;;  %v557_v39 = vmax.f32 %v483_v35, 0.0 }
 0x11e   :  { %v1574_v40 = vpop.f32.mrf.mxu0 }
 0x11f   :  { %v555_v42 = vmax.f32 %v475_v38, 0.0  ;;  %v585_v46 = vpack.c.bf16 %v557_v39, %v556_v43  ;;  %v496_v50 = vadd.f32 %v1574_v40, %v1806_v32 }
 0x120   :  { %v487_v44 = vpop.f32.mrf.mxu0 }
 0x121   :  { %v584_v45 = vpack.c.bf16 %v555_v42, %v554_v41  ;;  %v488_v48 = vadd.f32 %v1806_v32, %v487_v44  ;;  %v560_v57 = vmax.f32 %v496_v50, 0.0 }
 0x122   :  { %v1575_v47 = vpop.f32.mrf.mxu0 }
 0x123   :  { %v499_v49 = vadd.f32 %v1575_v47, %v1806_v32  ;;  %1620 = vmatprep.mubr.msk.bf16.mxu1 %vm613_vm2, %v584_v45  ;;  %v558_v55 = vmax.f32 %v488_v48, 0.0 }
 0x124   :  { %v490_v51 = vpop.f32.mrf.mxu0  ;;  %1621 = vmatmul.mubr.msk.bf16.gmra.mxu1 %vm613_vm2, %v585_v46 }
 0x125   :  { %v491_v52 = vadd.f32 %v1806_v32, %v490_v51  ;;  %v561_v53 = vmax.f32 %v499_v49, 0.0 }
 0x126   :  { %v1578_v54 = vpop.f32.mrf.mxu0 }
 0x127   :  { %v559_v56 = vmax.f32 %v491_v52, 0.0  ;;  %v587_v60 = vpack.c.bf16 %v561_v53, %v560_v57  ;;  %v512_v0 = vadd.f32 %v1578_v54, %v1806_v32 }
 0x128   :  { %v503_v58 = vpop.f32.mrf.mxu0 }
 0x129   :  { %v586_v59 = vpack.c.bf16 %v559_v56, %v558_v55  ;;  %v504_v62 = vadd.f32 %v1806_v32, %v503_v58  ;;  %v564_v6 = vmax.f32 %v512_v0, 0.0 }
 0x12a   :  { %v1579_v61 = vpop.f32.mrf.mxu0 }
 0x12b   :  { %v515_v63 = vadd.f32 %v1579_v61, %v1806_v32  ;;  %1624 = vmatprep.mubr.msk.bf16.mxu1 %vm613_vm2, %v586_v59  ;;  %v562_v4 = vmax.f32 %v504_v62, 0.0 }
 0x12c   :  { %v506_v1 = vpop.f32.mrf.mxu0  ;;  %1625 = vmatmul.mubr.msk.bf16.gmra.mxu1 %vm613_vm2, %v587_v60 }
 0x12d   :  { %v507_v2 = vadd.f32 %v1806_v32, %v506_v1  ;;  %v565_v3 = vmax.f32 %v515_v63, 0.0 }
 0x12f   :  { %v563_v5 = vmax.f32 %v507_v2, 0.0  ;;  %v589_v8 = vpack.c.bf16 %v565_v3, %v564_v6 }
 0x131   :  { %v588_v7 = vpack.c.bf16 %v563_v5, %v562_v4 }
 0x133   :  { %1628 = vmatprep.mubr.msk.bf16.mxu1 %vm613_vm2, %v588_v7 }
 0x134   :  { %1629 = vmatmul.mubr.msk.bf16.gmra.mxu1 %vm613_vm2, %v589_v8 }
 0x19c   :  { %v1586_v9 = vpop.f32.mrf.mxu1 }
 0x19d   :  { %v729_v32 = vadd.f32 %v1586_v9, %v1883_v10 }
 0x19e   :  { %v720_v11 = vpop.f32.mrf.mxu1 }
 0x19f   :  { %v721_v15 = vadd.f32 %v1883_v10, %v720_v11 }
 0x1a0   :  { %v1587_v12 = vpop.f32.mrf.mxu1 }
 0x1a1   :  { %v732_v13 = vadd.f32 %v1587_v12, %v1883_v10 }
 0x1a2   :  { %v723_v14 = vpop.f32.mrf.mxu1 }
 0x1a3   :  { %v1338_v16 = vpack.c.bf16 %v732_v13, %v729_v32  ;;  %v724_v17 = vadd.f32 %v1883_v10, %v723_v14 }
 0x1a4   :  { %v1590_v18 = vpop.f32.mrf.mxu1 }
 0x1a5   :  { %1450 = vst [vmem:[%s2010_s5 + $0x8] sm:$0xff] %v1338_v16   ;;  %v1333_v19 = vpack.c.bf16 %v724_v17, %v721_v15  ;;  %v745_v22 = vadd.f32 %v1590_v18, %v1883_v10 }
 0x1a6   :  { %v736_v20 = vpop.f32.mrf.mxu1 }
 0x1a7   :  { %1334 = vst [vmem:[%s2010_s5] sm:$0xff] %v1333_v19   ;;  %v737_v25 = vadd.f32 %v1883_v10, %v736_v20 }
 0x1a8   :  { %v1591_v21 = vpop.f32.mrf.mxu1 }
 0x1a9   :  { %v748_v23 = vadd.f32 %v1591_v21, %v1883_v10 }
 0x1aa   :  { %v739_v24 = vpop.f32.mrf.mxu1 }
 0x1ab   :  { %v1348_v26 = vpack.c.bf16 %v748_v23, %v745_v22  ;;  %v740_v27 = vadd.f32 %v1883_v10, %v739_v24 }
 0x1ac   :  { %v1594_v28 = vpop.f32.mrf.mxu1 }
 0x1ad   :  { %1452 = vst [vmem:[%s2010_s5 + $0x18] sm:$0xff] %v1348_v26   ;;  %v1343_v29 = vpack.c.bf16 %v740_v27, %v737_v25  ;;  %v761_v33 = vadd.f32 %v1594_v28, %v1883_v10 }
 0x1ae   :  { %v752_v30 = vpop.f32.mrf.mxu1 }
 0x1af   :  { %1451 = vst [vmem:[%s2010_s5 + $0x10] sm:$0xff] %v1343_v29   ;;  %v753_v36 = vadd.f32 %v1883_v10, %v752_v30 }
 0x1b0   :  { %v1595_v31 = vpop.f32.mrf.mxu1 }
 0x1b1   :  { %v764_v34 = vadd.f32 %v1595_v31, %v1883_v10 }
 0x1b2   :  { %v755_v35 = vpop.f32.mrf.mxu1 }
 0x1b3   :  { %v1358_v37 = vpack.c.bf16 %v764_v34, %v761_v33  ;;  %v756_v38 = vadd.f32 %v1883_v10, %v755_v35 }
 0x1b4   :  { %v1598_v39 = vpop.f32.mrf.mxu1 }
 0x1b5   :  { %1454 = vst [vmem:[%s2010_s5 + $0x28] sm:$0xff] %v1358_v37   ;;  %v1353_v40 = vpack.c.bf16 %v756_v38, %v753_v36  ;;  %v777_v43 = vadd.f32 %v1598_v39, %v1883_v10 }
 0x1b6   :  { %v768_v41 = vpop.f32.mrf.mxu1 }
 0x1b7   :  { %1453 = vst [vmem:[%s2010_s5 + $0x20] sm:$0xff] %v1353_v40   ;;  %v769_v46 = vadd.f32 %v1883_v10, %v768_v41 }
 0x1b8   :  { %v1599_v42 = vpop.f32.mrf.mxu1 }
 0x1b9   :  { %v780_v44 = vadd.f32 %v1599_v42, %v1883_v10 }
 0x1ba   :  { %v771_v45 = vpop.f32.mrf.mxu1 }
 0x1bb   :  { %v1368_v47 = vpack.c.bf16 %v780_v44, %v777_v43  ;;  %v772_v48 = vadd.f32 %v1883_v10, %v771_v45 }
 0x1bc   :  { %v1602_v49 = vpop.f32.mrf.mxu1 }
 0x1bd   :  { %1456 = vst [vmem:[%s2010_s5 + $0x38] sm:$0xff] %v1368_v47   ;;  %v1363_v50 = vpack.c.bf16 %v772_v48, %v769_v46  ;;  %v793_v53 = vadd.f32 %v1602_v49, %v1883_v10 }
 0x1be   :  { %v784_v51 = vpop.f32.mrf.mxu1 }
 0x1bf   :  { %1455 = vst [vmem:[%s2010_s5 + $0x30] sm:$0xff] %v1363_v50   ;;  %v785_v56 = vadd.f32 %v1883_v10, %v784_v51 }
 0x1c0   :  { %v1603_v52 = vpop.f32.mrf.mxu1 }
 0x1c1   :  { %v796_v54 = vadd.f32 %v1603_v52, %v1883_v10 }
 0x1c2   :  { %v787_v55 = vpop.f32.mrf.mxu1 }
 0x1c3   :  { %v1378_v57 = vpack.c.bf16 %v796_v54, %v793_v53  ;;  %v788_v58 = vadd.f32 %v1883_v10, %v787_v55 }
 0x1c4   :  { %v1606_v59 = vpop.f32.mrf.mxu1 }
 0x1c5   :  { %1458 = vst [vmem:[%s2010_s5 + $0x48] sm:$0xff] %v1378_v57   ;;  %v1373_v60 = vpack.c.bf16 %v788_v58, %v785_v56  ;;  %v809_v63 = vadd.f32 %v1606_v59, %v1883_v10 }
 0x1c6   :  { %v800_v61 = vpop.f32.mrf.mxu1 }
 0x1c7   :  { %1457 = vst [vmem:[%s2010_s5 + $0x40] sm:$0xff] %v1373_v60   ;;  %v801_v2 = vadd.f32 %v1883_v10, %v800_v61 }
 0x1c8   :  { %v1607_v62 = vpop.f32.mrf.mxu1 }
 0x1c9   :  { %v812_v0 = vadd.f32 %v1607_v62, %v1883_v10 }
 0x1ca   :  { %v803_v1 = vpop.f32.mrf.mxu1 }
 0x1cb   :  { %v1388_v3 = vpack.c.bf16 %v812_v0, %v809_v63  ;;  %v804_v4 = vadd.f32 %v1883_v10, %v803_v1 }
 0x1cc   :  { %v1610_v5 = vpop.f32.mrf.mxu1 }
 0x1cd   :  { %1460 = vst [vmem:[%s2010_s5 + $0x58] sm:$0xff] %v1388_v3   ;;  %v1383_v6 = vpack.c.bf16 %v804_v4, %v801_v2  ;;  %v825_v9 = vadd.f32 %v1610_v5, %v1883_v10 }
 0x1ce   :  { %v816_v7 = vpop.f32.mrf.mxu1 }
 0x1cf   :  { %1459 = vst [vmem:[%s2010_s5 + $0x50] sm:$0xff] %v1383_v6   ;;  %v817_v32 = vadd.f32 %v1883_v10, %v816_v7 }
 0x1d0   :  { %v1611_v8 = vpop.f32.mrf.mxu1 }
 0x1d1   :  { %v828_v11 = vadd.f32 %v1611_v8, %v1883_v10 }
 0x1d2   :  { %v819_v12 = vpop.f32.mrf.mxu1 }
 0x1d3   :  { %v1398_v13 = vpack.c.bf16 %v828_v11, %v825_v9  ;;  %v820_v14 = vadd.f32 %v1883_v10, %v819_v12 }
 0x1d4   :  { %v1614_v15 = vpop.f32.mrf.mxu1 }
 0x1d5   :  { %1462 = vst [vmem:[%s2010_s5 + $0x68] sm:$0xff] %v1398_v13   ;;  %v1393_v16 = vpack.c.bf16 %v820_v14, %v817_v32  ;;  %v841_v19 = vadd.f32 %v1614_v15, %v1883_v10 }
 0x1d6   :  { %v832_v17 = vpop.f32.mrf.mxu1 }
 0x1d7   :  { %1461 = vst [vmem:[%s2010_s5 + $0x60] sm:$0xff] %v1393_v16   ;;  %v833_v22 = vadd.f32 %v1883_v10, %v832_v17 }
 0x1d8   :  { %v1615_v18 = vpop.f32.mrf.mxu1 }
 0x1d9   :  { %v844_v20 = vadd.f32 %v1615_v18, %v1883_v10 }
 0x1da   :  { %v835_v21 = vpop.f32.mrf.mxu1 }
 0x1db   :  { %v1408_v23 = vpack.c.bf16 %v844_v20, %v841_v19  ;;  %v836_v24 = vadd.f32 %v1883_v10, %v835_v21 }
 0x1dc   :  { %v1618_v25 = vpop.f32.mrf.mxu1 }
 0x1dd   :  { %1464 = vst [vmem:[%s2010_s5 + $0x78] sm:$0xff] %v1408_v23   ;;  %v1403_v26 = vpack.c.bf16 %v836_v24, %v833_v22  ;;  %v857_v29 = vadd.f32 %v1618_v25, %v1883_v10 }
 0x1de   :  { %v848_v27 = vpop.f32.mrf.mxu1 }
 0x1df   :  { %1463 = vst [vmem:[%s2010_s5 + $0x70] sm:$0xff] %v1403_v26   ;;  %v849_v33 = vadd.f32 %v1883_v10, %v848_v27 }
 0x1e0   :  { %v1619_v28 = vpop.f32.mrf.mxu1 }
 0x1e1   :  { %v860_v30 = vadd.f32 %v1619_v28, %v1883_v10 }
 0x1e2   :  { %v851_v31 = vpop.f32.mrf.mxu1 }
 0x1e3   :  { %v1418_v34 = vpack.c.bf16 %v860_v30, %v857_v29  ;;  %v852_v35 = vadd.f32 %v1883_v10, %v851_v31 }
 0x1e4   :  { %v1622_v36 = vpop.f32.mrf.mxu1 }
 0x1e5   :  { %1466 = vst [vmem:[%s2010_s5 + $0x88] sm:$0xff] %v1418_v34   ;;  %v1413_v37 = vpack.c.bf16 %v852_v35, %v849_v33  ;;  %v873_v40 = vadd.f32 %v1622_v36, %v1883_v10 }
 0x1e6   :  { %v864_v38 = vpop.f32.mrf.mxu1 }
 0x1e7   :  { %1465 = vst [vmem:[%s2010_s5 + $0x80] sm:$0xff] %v1413_v37   ;;  %v865_v43 = vadd.f32 %v1883_v10, %v864_v38 }
 0x1e8   :  { %v1623_v39 = vpop.f32.mrf.mxu1 }
 0x1e9   :  { %v876_v41 = vadd.f32 %v1623_v39, %v1883_v10 }
 0x1ea   :  { %v867_v42 = vpop.f32.mrf.mxu1 }
 0x1eb   :  { %v1428_v44 = vpack.c.bf16 %v876_v41, %v873_v40  ;;  %v868_v45 = vadd.f32 %v1883_v10, %v867_v42 }
 0x1ec   :  { %v1626_v46 = vpop.f32.mrf.mxu1 }
 0x1ed   :  { %1468 = vst [vmem:[%s2010_s5 + $0x98] sm:$0xff] %v1428_v44   ;;  %v1423_v47 = vpack.c.bf16 %v868_v45, %v865_v43  ;;  %v889_v50 = vadd.f32 %v1626_v46, %v1883_v10 }
 0x1ee   :  { %v880_v48 = vpop.f32.mrf.mxu1 }
 0x1ef   :  { %1467 = vst [vmem:[%s2010_s5 + $0x90] sm:$0xff] %v1423_v47   ;;  %v881_v53 = vadd.f32 %v1883_v10, %v880_v48 }
 0x1f0   :  { %v1627_v49 = vpop.f32.mrf.mxu1 }
 0x1f1   :  { %v892_v51 = vadd.f32 %v1627_v49, %v1883_v10 }
 0x1f2   :  { %v883_v52 = vpop.f32.mrf.mxu1 }
 0x1f3   :  { %v1438_v54 = vpack.c.bf16 %v892_v51, %v889_v50  ;;  %v884_v55 = vadd.f32 %v1883_v10, %v883_v52 }
 0x1f4   :  { %v1630_v56 = vpop.f32.mrf.mxu1 }
 0x1f5   :  { %1470 = vst [vmem:[%s2010_s5 + $0xa8] sm:$0xff] %v1438_v54   ;;  %v1433_v57 = vpack.c.bf16 %v884_v55, %v881_v53  ;;  %v905_v60 = vadd.f32 %v1630_v56, %v1883_v10 }
 0x1f6   :  { %v896_v58 = vpop.f32.mrf.mxu1 }
 0x1f7   :  { %1469 = vst [vmem:[%s2010_s5 + $0xa0] sm:$0xff] %v1433_v57   ;;  %v897_v63 = vadd.f32 %v1883_v10, %v896_v58 }
 0x1f8   :  { %v1631_v59 = vpop.f32.mrf.mxu1 }
 0x1f9   :  { %v908_v61 = vadd.f32 %v1631_v59, %v1883_v10 }
 0x1fa   :  { %v899_v62 = vpop.f32.mrf.mxu1 }
 0x1fb   :  { %v1448_v0 = vpack.c.bf16 %v908_v61, %v905_v60  ;;  %v900_v1 = vadd.f32 %v1883_v10, %v899_v62 }
 0x1fd   :  { %1472 = vst [vmem:[%s2010_s5 + $0xb8] sm:$0xff] %v1448_v0   ;;  %v1443_v2 = vpack.c.bf16 %v900_v1, %v897_v63 }
 0x1ff   :  { %1471 = vst [vmem:[%s2010_s5 + $0xb0] sm:$0xff] %v1443_v2  }

</bundles_post_ra>
